<compile_context>
chip_gen: v7x
topology: tpu7x:2x2x1
jax: 0.10.0
libtpu: 0.0.40
codegen_flags: <defaults>
</compile_context>

<pallas_src>
import math

import jax
import jax.numpy as jnp
from jax.experimental import pallas as pl
from jax.experimental.pallas import tpu as pltpu


def _round_up(x: int, m: int) -> int:
    return ((x + m - 1) // m) * m


def _choose_tile(dim: int, target: int, align: int):
    """Balanced tiling of `dim` into equal align-multiple tiles of <=~target."""
    dim = max(int(dim), 1)
    num = max(1, -(-dim // target))          # number of tiles
    tile = _round_up(-(-dim // num), align)  # balanced tile size, aligned
    return tile, tile * num, num             # (tile, padded_dim, num_tiles)


def _tpu_generation() -> int:
    try:
        kind = jax.devices()[0].device_kind.lower()
    except Exception:
        return 6
    for g in (7, 6, 5, 4):
        if f"v{g}" in kind:
            return g
    return 6


def _vmem_capacity(default: int) -> int:
    try:
        return int(pltpu.get_tpu_info().vmem_capacity_bytes)
    except Exception:
        return default


def _lora_kernel(x_ref, w_ref, b_ref, enc_ref, dec_ref, o_ref, acc_ref, z_ref):
    """Grid = (M tiles, N tiles, K tiles); K is the in_features reduction."""
    n = pl.program_id(1)
    k = pl.program_id(2)

    @pl.when(k == 0)
    def _init_acc():
        # Fold the bias into the accumulator init (removes a full (tm,tn) VPU
        # add from the last-K step); k==0 has idle VPU time anyway.
        acc_ref[...] = jnp.broadcast_to(
            b_ref[...].astype(jnp.float32), acc_ref.shape)

    @pl.when((n == 0) & (k == 0))
    def _init_z():
        z_ref[...] = jnp.zeros_like(z_ref)

    x = x_ref[...]                                                  # (tm, tk)
    # Base linear partial: x_k @ W_k -> (tm, tn), f32 accumulate on the MXU.
    acc_ref[...] += jnp.dot(x, w_ref[...], preferred_element_type=jnp.float32)

    @pl.when(n == 0)
    def _enc():
        # LoRA encoder partial: x_k @ A_k -> (tm, h_pad); only once per M tile.
        z_ref[...] += jnp.dot(x, enc_ref[...],
                              preferred_element_type=jnp.float32)

    @pl.when(k == pl.num_programs(2) - 1)
    def _epilogue():
        # LoRA decoder: z @ B -> (tm, tn); one lane-dense store.
        # (z is f32; cast to the weight dtype for the MXU — acceptable for
        #  LoRA, slightly looser than an all-f32 reference under bf16.)
        lora = jnp.dot(z_ref[...].astype(dec_ref.dtype), dec_ref[...],
                       preferred_element_type=jnp.float32)
        o_ref[...] = (acc_ref[...] + lora).astype(o_ref.dtype)


def linear_lora_forward(x, w_lin, b_lin, w_enc, w_dec, *,
                        tm_target=None, tn_target=None, tk_target=None):
    """x: (..., in_features); weights in PyTorch layout:
       w_lin: (out, in), b_lin: (out,), w_enc: (hidden, in), w_dec: (out, hidden)."""
    out_features, in_features = w_lin.shape
    hidden_dim = w_enc.shape[0]
    batch_dims = x.shape[:-1]
    m = math.prod(batch_dims) if batch_dims else 1
    x2d = x.reshape(m, in_features)

    eb = jnp.dtype(x.dtype).itemsize
    sublane = max(8, 32 // eb)            # 8 for f32, 16 for bf16, 32 for int8

    # ---- generation-aware geometry -----------------------------------------
    gen = _tpu_generation()
    if gen >= 7:                          # v7x: 64 MiB VMEM, 2x256 MXU, 2 TCs
        lane_align = 256
        tm_t, tn_t, tk_t = 512, 512, 512
        cap = _vmem_capacity(64 << 20)
    elif gen == 6:                        # v6e: 128 MiB VMEM, 2x256 MXU
        lane_align = 256
        tm_t, tn_t, tk_t = 1024, 1024, 1024
        cap = _vmem_capacity(128 << 20)
    else:                                 # v5e & older: 128-wide MXU granule
        lane_align = 128
        tm_t, tn_t, tk_t = 1024, 1024, 1024
        cap = _vmem_capacity(128 << 20)
    tm_t = tm_target or tm_t
    tn_t = tn_target or tn_t
    tk_t = tk_target or tk_t

    tm, m_pad, num_m = _choose_tile(m, tm_t, sublane)
    tn, out_pad, num_n = _choose_tile(out_features, tn_t, lane_align)
    tk, k_pad, num_k = _choose_tile(in_features, tk_t, lane_align)
    h_pad = _round_up(hidden_dim, 128)    # LoRA rank stays 128-aligned

    def pad_to(a, shape):
        pads = [(0, t - s) for s, t in zip(a.shape, shape)]
        if any(p[1] for p in pads):
            a = jnp.pad(a, pads)
        return a

    # Frozen weights: one-time wrapper-side transpose to [K,N]/[K,H]/[H,N] so
    # every in-kernel dot is a plain [M,K]@[K,N] contraction (no in-kernel
    # weight relayout possible).
    x_p = pad_to(x2d, (m_pad, k_pad))
    w_p = pad_to(jnp.transpose(w_lin), (k_pad, out_pad))
    b_p = pad_to(b_lin.reshape(1, out_features), (1, out_pad))
    enc_p = pad_to(jnp.transpose(w_enc), (k_pad, h_pad))
    dec_p = pad_to(jnp.transpose(w_dec), (h_pad, out_pad))

    # ---- VMEM budget (double-buffered tiles + f32 scratch) -----------------
    vmem_bytes = (
        2 * tm * tk * eb            # x tiles
        + 2 * tk * tn * eb          # W_lin tiles
        + 2 * tm * tn * eb          # out tiles
        + 2 * tk * h_pad * eb       # W_enc tiles
        + 2 * h_pad * tn * eb       # W_dec tiles
        + 2 * 8 * tn * eb           # bias tile (sublane-padded)
        + tm * tn * 4               # f32 base accumulator
        + tm * h_pad * 4            # f32 LoRA z accumulator
    )
    vmem_limit = min(int(0.85 * cap), max(vmem_bytes * 5 // 4, 32 << 20))
    vmem_limit = max(vmem_limit, vmem_bytes)

    flops = 2 * m * (in_features * out_features
                     + in_features * hidden_dim
                     + hidden_dim * out_features)
    bytes_accessed = eb * (
        num_n * m_pad * k_pad          # x re-streamed once per N tile
        + num_m * k_pad * out_pad      # W_lin re-streamed once per M tile
        + num_m * k_pad * h_pad        # W_enc streamed once per M tile (n==0)
        + num_m * h_pad * out_pad      # W_dec streamed once per M tile
        + out_pad                      # bias
        + m_pad * out_pad)             # output
    cost = pl.CostEstimate(flops=int(flops), transcendentals=0,
                           bytes_accessed=int(bytes_accessed))

    out_p = pl.pallas_call(
        _lora_kernel,
        out_shape=jax.ShapeDtypeStruct((m_pad, out_pad), x.dtype),
        grid_spec=pltpu.PrefetchScalarGridSpec(
            num_scalar_prefetch=0,
            grid=(num_m, num_n, num_k),
            in_specs=[
                pl.BlockSpec((tm, tk), lambda i, j, k: (i, k)),       # x
                pl.BlockSpec((tk, tn), lambda i, j, k: (k, j)),       # W_lin^T
                pl.BlockSpec((1, tn), lambda i, j, k: (0, j)),        # bias
                # Encoder slabs are only consumed at n==0; collapse the block
                # index to 0 for n>0 so they aren't re-streamed per N tile.
                pl.BlockSpec((tk, h_pad),
                             lambda i, j, k: (jnp.where(j == 0, k, 0), 0)),
                pl.BlockSpec((h_pad, tn), lambda i, j, k: (0, j)),    # W_dec^T
            ],
            out_specs=pl.BlockSpec((tm, tn), lambda i, j, k: (i, j)),
            scratch_shapes=[
                pltpu.VMEM((tm, tn), jnp.float32),     # base accumulator
                pltpu.VMEM((tm, h_pad), jnp.float32),  # LoRA z accumulator
            ],
        ),
        compiler_params=pltpu.CompilerParams(
            # N stays "arbitrary": z (scratch) is written at n==0 and read by
            # every later n tile of the same m tile, so it must not be split
            # across cores; M is safely core-parallel.
            dimension_semantics=("parallel", "arbitrary", "arbitrary"),
            vmem_limit_bytes=int(vmem_limit),
        ),
        cost_estimate=cost,
    )(x_p, w_p, b_p, enc_p, dec_p)

    return out_p[:m, :out_features].reshape(*batch_dims, out_features)


def _reference(x, w_lin, b_lin, w_enc, w_dec):
    return (x @ w_lin.T + b_lin) + ((x @ w_enc.T) @ w_dec.T)


# TODO(synk): merge()/state_dict()/load_state_dict() are host-side weight
# management (no forward compute) and are intentionally not kernelized.

if __name__ == "__main__":
    # Small shapes consistent with the module: nn.Linear(in=32, out=24), hidden_dim=5.
    batch, seq = 2, 8
    in_features, out_features, hidden_dim = 32, 24, 5

    key = jax.random.PRNGKey(0)
    kx, kw, kb, kenc, kdec, kx2, kx3, kw3, kb3, ke3, kd3 = jax.random.split(key, 11)

    x = jax.random.normal(kx, (batch, seq, in_features), dtype=jnp.float32)
    w_lin = jax.random.normal(kw, (out_features, in_features), jnp.float32) * 0.1
    b_lin = jax.random.normal(kb, (out_features,), jnp.float32) * 0.1
    w_enc = jax.random.normal(kenc, (hidden_dim, in_features), jnp.float32) * 0.1

    # Case 1: dec zero-initialized, exactly as LinearLoRA.__init__ does.
    w_dec0 = jnp.zeros((out_features, hidden_dim), dtype=jnp.float32)
    out0 = jax.block_until_ready(linear_lora_forward(x, w_lin, b_lin, w_enc, w_dec0))
    ref0 = _reference(x, w_lin, b_lin, w_enc, w_dec0)
    assert out0.shape == (batch, seq, out_features)
    assert jnp.allclose(out0, ref0, atol=1e-5, rtol=1e-5)

    # Case 2: non-zero dec (post-training state) + ragged row count (seq=7)
    # to exercise M padding/slicing.
    w_dec = jax.random.normal(kdec, (out_features, hidden_dim), jnp.float32) * 0.1
    x2 = jax.random.normal(kx2, (batch, 7, in_features), dtype=jnp.float32)
    out1 = jax.block_until_ready(linear_lora_forward(x2, w_lin, b_lin, w_enc, w_dec))
    ref1 = _reference(x2, w_lin, b_lin, w_enc, w_dec)
    assert out1.shape == (batch, 7, out_features)
    assert jnp.allclose(out1, ref1, atol=1e-5, rtol=1e-5)

    # Case 3: force small tile targets so the full (M, N, K) grid, the n==0
    # encoder guard, and the K-accumulator epilogue are all exercised.
    in3, out3, h3 = 384, 300, 5
    x3 = jax.random.normal(kx3, (2, 40, in3), dtype=jnp.float32)
    w_lin3 = jax.random.normal(kw3, (out3, in3), jnp.float32) * 0.05
    b_lin3 = jax.random.normal(kb3, (out3,), jnp.float32) * 0.05
    w_enc3 = jax.random.normal(ke3, (h3, in3), jnp.float32) * 0.05
    w_dec3 = jax.random.normal(kd3, (out3, h3), jnp.float32) * 0.05
    out2 = jax.block_until_ready(
        linear_lora_forward(x3, w_lin3, b_lin3, w_enc3, w_dec3,
                            tm_target=16, tn_target=128, tk_target=128))
    ref2 = _reference(x3, w_lin3, b_lin3, w_enc3, w_dec3)
    assert out2.shape == (2, 40, out3)
    assert jnp.allclose(out2, ref2, atol=1e-3, rtol=1e-3)

    print("KERNEL_OK")
</pallas_src>

<mosaic_0001>
module attributes {stable_mosaic.version = 11 : i64} {
  func.func @_lora_kernel(%arg0: i32, %arg1: i32, %arg2: i32, %arg3: memref<16x256xf32, #tpu.memory_space<vmem>>, %arg4: memref<256x256xf32, #tpu.memory_space<vmem>>, %arg5: memref<1x256xf32, #tpu.memory_space<vmem>>, %arg6: memref<256x128xf32, #tpu.memory_space<vmem>>, %arg7: memref<128x256xf32, #tpu.memory_space<vmem>>, %arg8: memref<16x256xf32, #tpu.memory_space<vmem>>, %arg9: memref<16x256xf32, #tpu.memory_space<vmem>>, %arg10: memref<16x128xf32, #tpu.memory_space<vmem>>) attributes {dimension_semantics = [#tpu.dimension_semantics<parallel>, #tpu.dimension_semantics<arbitrary>, #tpu.dimension_semantics<arbitrary>], iteration_bounds = array<i64: 1, 1, 1>, scalar_prefetch = 0 : i64, scratch_operands = 2 : i64, tpu.core_type = #tpu.core_type<tc>, window_params = [{transform_indices = @transform_0, window_bounds = array<i64: 16, 256>}, {transform_indices = @transform_1, window_bounds = array<i64: 256, 256>}, {transform_indices = @transform_2, window_bounds = array<i64: 1, 256>}, {transform_indices = @transform_3, window_bounds = array<i64: 256, 128>}, {transform_indices = @transform_4, window_bounds = array<i64: 128, 256>}, {transform_indices = @transform_5, window_bounds = array<i64: 16, 256>}]} {
    %c0_i32 = arith.constant 0 : i32
    %0 = arith.cmpi eq, %arg2, %c0_i32 : i32
    %1 = arith.extui %0 : i1 to i32
    %c0_i32_0 = arith.constant 0 : i32
    %2 = arith.cmpi ne, %1, %c0_i32_0 : i32
    scf.if %2 {
      %c0_15 = arith.constant 0 : index
      %c0_16 = arith.constant 0 : index
      %20 = vector.load %arg5[%c0_15, %c0_16] : memref<1x256xf32, #tpu.memory_space<vmem>>, vector<1x256xf32>
      %21 = vector.shape_cast %20 : vector<1x256xf32> to vector<1x256xf32>
      %22 = vector.broadcast %21 : vector<1x256xf32> to vector<16x256xf32>
      %c0_17 = arith.constant 0 : index
      %c0_18 = arith.constant 0 : index
      %23 = vector.load %arg9[%c0_17, %c0_18] : memref<16x256xf32, #tpu.memory_space<vmem>>, vector<16x256xf32>
      tpu.vector_store %arg9[%c0_17, %c0_18], %22 {strides = array<i32>} : memref<16x256xf32, #tpu.memory_space<vmem>>, vector<16x256xf32>,
    } else {
    }
    %c0_i32_1 = arith.constant 0 : i32
    %3 = arith.cmpi eq, %arg1, %c0_i32_1 : i32
    %c0_i32_2 = arith.constant 0 : i32
    %4 = arith.cmpi eq, %arg2, %c0_i32_2 : i32
    %5 = arith.andi %3, %4 : i1
    %6 = arith.extui %5 : i1 to i32
    %c0_i32_3 = arith.constant 0 : i32
    %7 = arith.cmpi ne, %6, %c0_i32_3 : i32
    scf.if %7 {
      %cst_15 = arith.constant 0.000000e+00 : f32
      %20 = vector.broadcast %cst_15 : f32 to vector<16x128xf32>
      %c0_16 = arith.constant 0 : index
      %c0_17 = arith.constant 0 : index
      %21 = vector.load %arg10[%c0_16, %c0_17] : memref<16x128xf32, #tpu.memory_space<vmem>>, vector<16x128xf32>
      tpu.vector_store %arg10[%c0_16, %c0_17], %20 {strides = array<i32>} : memref<16x128xf32, #tpu.memory_space<vmem>>, vector<16x128xf32>,
    } else {
    }
    %c0 = arith.constant 0 : index
    %c0_4 = arith.constant 0 : index
    %8 = vector.load %arg3[%c0, %c0_4] : memref<16x256xf32, #tpu.memory_space<vmem>>, vector<16x256xf32>
    %c0_5 = arith.constant 0 : index
    %c0_6 = arith.constant 0 : index
    %9 = vector.load %arg9[%c0_5, %c0_6] : memref<16x256xf32, #tpu.memory_space<vmem>>, vector<16x256xf32>
    %c0_7 = arith.constant 0 : index
    %c0_8 = arith.constant 0 : index
    %10 = vector.load %arg4[%c0_7, %c0_8] : memref<256x256xf32, #tpu.memory_space<vmem>>, vector<256x256xf32>
    %cst = arith.constant dense<0.000000e+00> : vector<16x256xf32>
    %11 = tpu.matmul %8, %10, %cst {dimension_numbers = #tpu.dot_dimension_numbers<[1], [0], [0], [1], [0, 0, 1, 1], [], []>} : vector<16x256xf32>, vector<256x256xf32>, vector<16x256xf32> -> vector<16x256xf32>
    %12 = arith.addf %9, %11 : vector<16x256xf32>
    %c0_9 = arith.constant 0 : index
    %c0_10 = arith.constant 0 : index
    %13 = vector.load %arg9[%c0_9, %c0_10] : memref<16x256xf32, #tpu.memory_space<vmem>>, vector<16x256xf32>
    tpu.vector_store %arg9[%c0_9, %c0_10], %12 {strides = array<i32>} : memref<16x256xf32, #tpu.memory_space<vmem>>, vector<16x256xf32>,
    %c0_i32_11 = arith.constant 0 : i32
    %14 = arith.cmpi eq, %arg1, %c0_i32_11 : i32
    %15 = arith.extui %14 : i1 to i32
    %c0_i32_12 = arith.constant 0 : i32
    %16 = arith.cmpi ne, %15, %c0_i32_12 : i32
    scf.if %16 {
      %c0_15 = arith.constant 0 : index
      %c0_16 = arith.constant 0 : index
      %20 = vector.load %arg10[%c0_15, %c0_16] : memref<16x128xf32, #tpu.memory_space<vmem>>, vector<16x128xf32>
      %c0_17 = arith.constant 0 : index
      %c0_18 = arith.constant 0 : index
      %21 = vector.load %arg6[%c0_17, %c0_18] : memref<256x128xf32, #tpu.memory_space<vmem>>, vector<256x128xf32>
      %cst_19 = arith.constant dense<0.000000e+00> : vector<16x128xf32>
      %22 = tpu.matmul %8, %21, %cst_19 {dimension_numbers = #tpu.dot_dimension_numbers<[1], [0], [0], [1], [0, 0, 1, 1], [], []>} : vector<16x256xf32>, vector<256x128xf32>, vector<16x128xf32> -> vector<16x128xf32>
      %23 = arith.addf %20, %22 : vector<16x128xf32>
      %c0_20 = arith.constant 0 : index
      %c0_21 = arith.constant 0 : index
      %24 = vector.load %arg10[%c0_20, %c0_21] : memref<16x128xf32, #tpu.memory_space<vmem>>, vector<16x128xf32>
      tpu.vector_store %arg10[%c0_20, %c0_21], %23 {strides = array<i32>} : memref<16x128xf32, #tpu.memory_space<vmem>>, vector<16x128xf32>,
    } else {
    }
    %c0_i32_13 = arith.constant 0 : i32
    %17 = arith.cmpi eq, %arg2, %c0_i32_13 : i32
    %18 = arith.extui %17 : i1 to i32
    %c0_i32_14 = arith.constant 0 : i32
    %19 = arith.cmpi ne, %18, %c0_i32_14 : i32
    scf.if %19 {
      %c0_15 = arith.constant 0 : index
      %c0_16 = arith.constant 0 : index
      %20 = vector.load %arg10[%c0_15, %c0_16] : memref<16x128xf32, #tpu.memory_space<vmem>>, vector<16x128xf32>
      %c0_17 = arith.constant 0 : index
      %c0_18 = arith.constant 0 : index
      %21 = vector.load %arg7[%c0_17, %c0_18] : memref<128x256xf32, #tpu.memory_space<vmem>>, vector<128x256xf32>
      %cst_19 = arith.constant dense<0.000000e+00> : vector<16x256xf32>
      %22 = tpu.matmul %20, %21, %cst_19 {dimension_numbers = #tpu.dot_dimension_numbers<[1], [0], [0], [1], [0, 0, 1, 1], [], []>} : vector<16x128xf32>, vector<128x256xf32>, vector<16x256xf32> -> vector<16x256xf32>
      %c0_20 = arith.constant 0 : index
      %c0_21 = arith.constant 0 : index
      %23 = vector.load %arg9[%c0_20, %c0_21] : memref<16x256xf32, #tpu.memory_space<vmem>>, vector<16x256xf32>
      %24 = arith.addf %23, %22 : vector<16x256xf32>
      %c0_22 = arith.constant 0 : index
      %c0_23 = arith.constant 0 : index
      %25 = vector.load %arg8[%c0_22, %c0_23] : memref<16x256xf32, #tpu.memory_space<vmem>>, vector<16x256xf32>
      tpu.vector_store %arg8[%c0_22, %c0_23], %24 {strides = array<i32>} : memref<16x256xf32, #tpu.memory_space<vmem>>, vector<16x256xf32>,
    } else {
    }
    return
  }
  func.func @transform_0(%arg0: i32, %arg1: i32, %arg2: i32) -> (i32, i32) {
    %c0_i32 = arith.constant 0 : i32
    return %arg0, %arg2 : i32, i32
  }
  func.func @transform_1(%arg0: i32, %arg1: i32, %arg2: i32) -> (i32, i32) {
    %c0_i32 = arith.constant 0 : i32
    return %arg2, %arg1 : i32, i32
  }
  func.func @transform_2(%arg0: i32, %arg1: i32, %arg2: i32) -> (i32, i32) {
    %c0_i32 = arith.constant 0 : i32
    %c0_i32_0 = arith.constant 0 : i32
    return %c0_i32, %arg1 : i32, i32
  }
  func.func @transform_3(%arg0: i32, %arg1: i32, %arg2: i32) -> (i32, i32) {
    %c0_i32 = arith.constant 0 : i32
    %0 = arith.cmpi eq, %arg1, %c0_i32 : i32
    %c0_i32_0 = arith.constant 0 : i32
    %1 = arith.select %0, %arg2, %c0_i32_0 : i32
    %c0_i32_1 = arith.constant 0 : i32
    %c0_i32_2 = arith.constant 0 : i32
    return %1, %c0_i32_1 : i32, i32
  }
  func.func @transform_4(%arg0: i32, %arg1: i32, %arg2: i32) -> (i32, i32) {
    %c0_i32 = arith.constant 0 : i32
    %c0_i32_0 = arith.constant 0 : i32
    return %c0_i32, %arg1 : i32, i32
  }
  func.func @transform_5(%arg0: i32, %arg1: i32, %arg2: i32) -> (i32, i32) {
    %c0_i32 = arith.constant 0 : i32
    return %arg0, %arg1 : i32, i32
  }
}

</mosaic_0001>

<bundles_post_ra>
// kernel: tpu_custom_call.1
= control target key start
LH: loop header
LB: loop body
LE: loop exit
PB: predicated region body
PF: predicated region fallthrough
CT: control target
= control target key end

     0   :  { %10 = vsyncpa [#allocation5], 0  ;;  %s967_s0 = inlined_call_operand.hbm [shape: f32[16,256], index: 0, kind: input, shape index: {}]   ;;  %s968_s1 = inlined_call_operand.hbm [shape: f32[256,256], index: 1, kind: input, shape index: {}]   ;;  %s969_s2 = inlined_call_operand.vmem [shape: f32[1,256], index: 2, kind: input, shape index: {}]   ;;  %s970_s3 = inlined_call_operand.hbm [shape: f32[256,128], index: 3, kind: input, shape index: {}]   ;;  %s971_s4 = inlined_call_operand.hbm [shape: f32[128,256], index: 4, kind: input, shape index: {}]   ;;  %s972_s5 = inlined_call_operand.hbm [shape: f32[16,256], index: 5, kind: output, shape index: {}]  }
   0x1   :  { %11 = vsyncpa [#allocation8], 0 }
   0x2   :  { %12 = vsyncpa [#allocation11], 0 }
   0x3   :  { %13 = vsyncpa [#allocation6], 0  ;;  %s833_s18 = smov [#allocation7]   ;;  %s834_s20 = smov [#allocation4]  }
   0x4   :  { %s31_s19 = sshll.u32 %s833_s18, 4  ;;  %s19_s21 = sshll.u32 %s834_s20, 4  ;;  %s32_s19 = int_to_ptr.vmem [resolvable:$true] %s31_s19  ;;  %s873_s21 = int_to_ptr.vmem [resolvable:$true] %s19_s21 }
   0x5   :  { %s715_s24 = scalar_lea.hbm %s968_s1, 8192 }
   0x6   :  { %p716_p0 = scmp.ne.s32.totalorder %s968_s1, %s715_s24  ;;  %p719_p1 = scmp.lt.u32.totalorder %s715_s24, %s968_s1 }
   0x8   :  { %p721_p2 = pnand %p719_p1, %p716_p0 }
   0xa   :  { %724 = shalt.err (!%p721_p2)
}
   0xb   :  { %s725_s29 = scalar_lea.vmem %s32_s19, 8192  ;;  %p730_p4 = scmp.lt.s32.totalorder %s32_s19, %s32_s19 }
   0xc   :  { %p726_p3 = scmp.ne.s32.totalorder %s32_s19, %s725_s29  ;;  %p731_p5 = scmp.lt.s32.totalorder %s725_s29, %s725_s29 }
   0xe   :  { %p732_p6 = por %p731_p5, %p730_p4 }
  0x10   :  { %p733_p7 = pnand %p732_p6, %p726_p3 }
  0x12   :  { %736 = shalt.err (!%p733_p7)
}
  0x13   :  { %s835_s30 = smov 256   ;;  %s836_s6 = smov 16  }
  0x14   :  { %37 = dma.hbm_to_vmem [thread:$0]  %s968_s1, 8192, %s32_s19, [#allocation8], %s835_s30, %s835_s30, %s836_s6  }
  0x15   :  { %s737_s11 = scalar_lea.hbm %s967_s0, 512 }
  0x16   :  { %p738_p8 = scmp.ne.s32.totalorder %s967_s0, %s737_s11  ;;  %p741_p9 = scmp.lt.u32.totalorder %s737_s11, %s967_s0 }
  0x18   :  { %p743_p10 = pnand %p741_p9, %p738_p8 }
  0x1a   :  { %746 = shalt.err (!%p743_p10)
}
  0x1b   :  { %s747_s16 = scalar_lea.vmem %s873_s21, 512  ;;  %p752_p12 = scmp.lt.s32.totalorder %s873_s21, %s873_s21 }
  0x1c   :  { %p748_p11 = scmp.ne.s32.totalorder %s873_s21, %s747_s16  ;;  %p753_p13 = scmp.lt.s32.totalorder %s747_s16, %s747_s16 }
  0x1e   :  { %p754_p0 = por %p753_p13, %p752_p12 }
  0x20   :  { %p755_p1 = pnand %p754_p0, %p748_p11 }
  0x22   :  { %758 = shalt.err (!%p755_p1)
}
  0x23   :  { %25 = dma.hbm_to_vmem [thread:$0]  %s967_s0, 512, %s873_s21, [#allocation5], %s835_s30, %s835_s30, %s836_s6  }
  0x24   :  { %s837_s18 = smov [#allocation9]   ;;  %s759_s23 = scalar_lea.hbm %s970_s3, 4096 }
  0x25   :  { %s50_s19 = sshll.u32 %s837_s18, 4  ;;  %p760_p2 = scmp.ne.s32.totalorder %s970_s3, %s759_s23  ;;  %s51_s19 = int_to_ptr.vmem [resolvable:$true] %s50_s19 }
  0x26   :  { %p763_p3 = scmp.lt.u32.totalorder %s759_s23, %s970_s3 }
  0x28   :  { %p765_p4 = pnand %p763_p3, %p760_p2 }
  0x2a   :  { %768 = shalt.err (!%p765_p4)
}
  0x2b   :  { %s769_s28 = scalar_lea.vmem %s51_s19, 4096  ;;  %p774_p6 = scmp.lt.s32.totalorder %s51_s19, %s51_s19 }
  0x2c   :  { %p770_p5 = scmp.ne.s32.totalorder %s51_s19, %s769_s28  ;;  %p775_p7 = scmp.lt.s32.totalorder %s769_s28, %s769_s28 }
  0x2e   :  { %p776_p8 = por %p775_p7, %p774_p6 }
  0x30   :  { %p777_p9 = pnand %p776_p8, %p770_p5 }
  0x32   :  { %780 = shalt.err (!%p777_p9)
}
  0x33   :  { %s838_s0 = smov 128   ;;  %s839_s21 = smov 8  }
  0x34   :  { %56 = dma.hbm_to_vmem [thread:$0]  %s970_s3, 4096, %s51_s19, [#allocation8], %s838_s0, %s838_s0, %s839_s21  }
  0x35   :  { %s840_s8 = smov [#allocation10]   ;;  %s781_s12 = scalar_lea.hbm %s971_s4, 4096 }
  0x36   :  { %s62_s9 = sshll.u32 %s840_s8, 4  ;;  %p782_p10 = scmp.ne.s32.totalorder %s971_s4, %s781_s12  ;;  %s63_s9 = int_to_ptr.vmem [resolvable:$true] %s62_s9 }
  0x37   :  { %p785_p11 = scmp.lt.u32.totalorder %s781_s12, %s971_s4 }
  0x39   :  { %p787_p12 = pnand %p785_p11, %p782_p10 }
  0x3b   :  { %790 = shalt.err (!%p787_p12)
}
  0x3c   :  { %s791_s1 = scalar_lea.vmem %s63_s9, 4096  ;;  %p796_p0 = scmp.lt.s32.totalorder %s63_s9, %s63_s9 }
  0x3d   :  { %p792_p13 = scmp.ne.s32.totalorder %s63_s9, %s791_s1  ;;  %p797_p1 = scmp.lt.s32.totalorder %s791_s1, %s791_s1 }
  0x3f   :  { %p798_p2 = por %p797_p1, %p796_p0 }
  0x41   :  { %p799_p3 = pnand %p798_p2, %p792_p13 }
  0x43   :  { %802 = shalt.err (!%p799_p3)
}
  0x44   :  { %68 = dma.hbm_to_vmem [thread:$0]  %s971_s4, 4096, %s63_s9, [#allocation11], %s835_s30, %s835_s30, %s836_s6  }
  0x45   :  { %825 = dma.done.wait [#allocation5], 512  }
  0x46   :  { %826 = vsyncadd [#allocation5], 4294966784 }
  0x47   :  { %827 = dma.done.wait [#allocation8], 12288  }
  0x48   :  { %828 = vsyncadd [#allocation8], 4294955008 }
  0x49   :  { %829 = dma.done.wait [#allocation11], 4096  }
  0x4a   :  { %830 = vsyncadd [#allocation11], 4294963200  ;;  %v289_v0 = vld [vmem:[#allocation9 + $0x80] sm:$0xff]  ;;  %v290_v1 = vld [vmem:[#allocation9 + $0x88] sm:$0xff]  ;;  %s842_s19 = smov [#allocation12]  }
  0x4b   :  { %v273_v2 = vld [vmem:[#allocation9] sm:$0xff]  ;;  %v633_v3 = vpack.c.bf16 %v290_v1, %v289_v0  ;;  %v274_v4 = vld [vmem:[#allocation9 + $0x8] sm:$0xff]  ;;  %v291_v5 = vld [vmem:[#allocation9 + $0x90] sm:$0xff]  ;;  %s515_s20 = sshll.u32 %s842_s19, 4  ;;  %s516_s20 = int_to_ptr.vmem [resolvable:$true] %s515_s20 }
  0x4c   :  { %v292_v6 = vld [vmem:[#allocation9 + $0x98] sm:$0xff]  ;;  %v635_v7 = vpack.c.bf16 %v274_v4, %v273_v2  ;;  %v275_v9 = vld [vmem:[#allocation9 + $0x10] sm:$0xff]  ;;  %v293_v11 = vld [vmem:[#allocation9 + $0xa0] sm:$0xff]  ;;  %p808_p5 = scmp.lt.s32.totalorder %s516_s20, %s516_s20 }
  0x4d   :  { %v637_v8 = vpack.c.bf16 %v292_v6, %v291_v5  ;;  %v276_v10 = vld [vmem:[#allocation9 + $0x18] sm:$0xff]  ;;  %634 = vmatprep.subr.bf16.mxu1 %v633_v3  ;;  %v294_v12 = vld [vmem:[#allocation9 + $0xa8] sm:$0xff]  ;;  %v277_v15 = vld [vmem:[#allocation9 + $0x20] sm:$0xff] }
  0x4e   :  { %636 = vmatpush3.bf16.msra.mxu1 %v635_v7  ;;  %v639_v13 = vpack.c.bf16 %v276_v10, %v275_v9  ;;  %v641_v14 = vpack.c.bf16 %v294_v12, %v293_v11  ;;  %v278_v16 = vld [vmem:[#allocation9 + $0x28] sm:$0xff]  ;;  %v295_v17 = vld [vmem:[#allocation9 + $0xb0] sm:$0xff]  ;;  %v296_v18 = vld [vmem:[#allocation9 + $0xb8] sm:$0xff] }
  0x4f   :  { %638 = vmatprep.subr.bf16.mxu1 %v637_v8  ;;  %v643_v19 = vpack.c.bf16 %v278_v16, %v277_v15  ;;  %v645_v20 = vpack.c.bf16 %v296_v18, %v295_v17  ;;  %v279_v21 = vld [vmem:[#allocation9 + $0x30] sm:$0xff]  ;;  %v280_v22 = vld [vmem:[#allocation9 + $0x38] sm:$0xff]  ;;  %v297_v23 = vld [vmem:[#allocation9 + $0xc0] sm:$0xff] }
  0x50   :  { %v298_v24 = vld [vmem:[#allocation9 + $0xc8] sm:$0xff]  ;;  %v281_v26 = vld [vmem:[#allocation9 + $0x40] sm:$0xff]  ;;  %v647_v28 = vpack.c.bf16 %v280_v22, %v279_v21  ;;  %v299_v29 = vld [vmem:[#allocation9 + $0xd0] sm:$0xff] }
  0x51   :  { %v112_v25 = vld [vmem:[#allocation4 + $0x8] sm:$0xff]  ;;  %v300_v30 = vld [vmem:[#allocation9 + $0xd8] sm:$0xff]  ;;  %v119_v33 = vld [vmem:[#allocation7] sm:$0xff]  ;;  %v649_v34 = vpack.c.bf16 %v298_v24, %v297_v23 }
  0x52   :  { %640 = vmatpush3.bf16.msra.mxu1 %v639_v13  ;;  %v282_v27 = vld [vmem:[#allocation9 + $0x48] sm:$0xff]  ;;  %369 = vmatprep.mubr.f32.mxu1 %v112_v25  ;;  %v122_v32 = vld [vmem:[#allocation7 + $0x18] sm:$0xff]  ;;  %v121_v36 = vld [vmem:[#allocation7 + $0x10] sm:$0xff]  ;;  %v653_v49 = vpack.c.bf16 %v300_v30, %v299_v29 }
  0x53   :  { %642 = vmatprep.subr.bf16.mxu1 %v641_v14  ;;  %247 = vmatprep.mubr.f32.mxu0 %v112_v25  ;;  %v120_v31 = vld [vmem:[#allocation7 + $0x8] sm:$0xff]  ;;  %v126_v38 = vld [vmem:[#allocation7 + $0x38] sm:$0xff]  ;;  %v571_v39 = vpack.c.bf16 %v121_v36, %v119_v33  ;;  %v123_v41 = vld [vmem:[#allocation7 + $0x20] sm:$0xff]  ;;  %v651_v45 = vpack.c.bf16 %v282_v27, %v281_v26 }
  0x54   :  { %v569_v35 = vpack.c.bf16 %v122_v32, %v120_v31  ;;  %v124_v37 = vld [vmem:[#allocation7 + $0x28] sm:$0xff]  ;;  %v125_v42 = vld [vmem:[#allocation7 + $0x30] sm:$0xff]  ;;  %v130_v44 = vld [vmem:[#allocation7 + $0x58] sm:$0xff] }
  0x55   :  { %v573_v40 = vpack.c.bf16 %v126_v38, %v124_v37  ;;  %v128_v43 = vld [vmem:[#allocation7 + $0x48] sm:$0xff]  ;;  %v283_v46 = vld [vmem:[#allocation9 + $0x50] sm:$0xff]  ;;  %v284_v47 = vld [vmem:[#allocation9 + $0x58] sm:$0xff]  ;;  %v575_v48 = vpack.c.bf16 %v125_v42, %v123_v41 }
  0x56   :  { %644 = vmatpush3.bf16.msra.mxu1 %v643_v19  ;;  %570 = vmatprep.subr.bf16.mxu0 %v569_v35  ;;  %v301_v50 = vld [vmem:[#allocation9 + $0xe0] sm:$0xff]  ;;  %v577_v51 = vpack.c.bf16 %v130_v44, %v128_v43  ;;  %v129_v53 = vld [vmem:[#allocation7 + $0x50] sm:$0xff]  ;;  %v302_v54 = vld [vmem:[#allocation9 + $0xe8] sm:$0xff]  ;;  %v655_v57 = vpack.c.bf16 %v284_v47, %v283_v46 }
  0x57   :  { %646 = vmatprep.subr.bf16.mxu1 %v645_v20  ;;  %572 = vmatpush1.bf16.msra.mxu0 %v571_v39  ;;  %v127_v52 = vld [vmem:[#allocation7 + $0x40] sm:$0xff]  ;;  %v132_v55 = vld [vmem:[#allocation7 + $0x68] sm:$0xff]  ;;  %v134_v56 = vld [vmem:[#allocation7 + $0x78] sm:$0xff]  ;;  %v657_v61 = vpack.c.bf16 %v302_v54, %v301_v50 }
  0x58   :  { %574 = vmatprep.subr.bf16.mxu0 %v573_v40  ;;  %v285_v58 = vld [vmem:[#allocation9 + $0x60] sm:$0xff]  ;;  %v286_v59 = vld [vmem:[#allocation9 + $0x68] sm:$0xff]  ;;  %v579_v60 = vpack.c.bf16 %v129_v53, %v127_v52  ;;  %v303_v62 = vld [vmem:[#allocation9 + $0xf0] sm:$0xff]  ;;  %v581_v63 = vpack.c.bf16 %v134_v56, %v132_v55 }
  0x59   :  { %v131_v0 = vld [vmem:[#allocation7 + $0x60] sm:$0xff]  ;;  %v133_v1 = vld [vmem:[#allocation7 + $0x70] sm:$0xff]  ;;  %v304_v2 = vld [vmem:[#allocation9 + $0xf8] sm:$0xff]  ;;  %v659_v5 = vpack.c.bf16 %v286_v59, %v285_v58 }
  0x5a   :  { %648 = vmatpush3.bf16.msra.mxu1 %v647_v28  ;;  %v136_v3 = vld [vmem:[#allocation7 + $0x88] sm:$0xff]  ;;  %v138_v4 = vld [vmem:[#allocation7 + $0x98] sm:$0xff]  ;;  %v287_v6 = vld [vmem:[#allocation9 + $0x70] sm:$0xff]  ;;  %v583_v8 = vpack.c.bf16 %v133_v1, %v131_v0  ;;  %v661_v9 = vpack.c.bf16 %v304_v2, %v303_v62 }
  0x5b   :  { %650 = vmatprep.subr.bf16.mxu1 %v649_v34  ;;  %576 = vmatpush1.bf16.msra.mxu0 %v575_v48  ;;  %v288_v7 = vld [vmem:[#allocation9 + $0x78] sm:$0xff]  ;;  %v585_v10 = vpack.c.bf16 %v138_v4, %v136_v3  ;;  %v135_v11 = vld [vmem:[#allocation7 + $0x80] sm:$0xff]  ;;  %v137_v12 = vld [vmem:[#allocation7 + $0x90] sm:$0xff] }
  0x5c   :  { %578 = vmatprep.subr.bf16.mxu0 %v577_v51  ;;  %v140_v13 = vld [vmem:[#allocation7 + $0xa8] sm:$0xff]  ;;  %v142_v14 = vld [vmem:[#allocation7 + $0xb8] sm:$0xff]  ;;  %v663_v17 = vpack.c.bf16 %v288_v7, %v287_v6  ;;  %v587_v18 = vpack.c.bf16 %v137_v12, %v135_v11  ;;  %v139_v20 = vld [vmem:[#allocation7 + $0xa0] sm:$0xff] }
  0x5d   :  { %v390_v15 = vld [vmem:[#allocation10 + $0x8] sm:$0xff]  ;;  %v392_v16 = vld [vmem:[#allocation10 + $0x18] sm:$0xff]  ;;  %v589_v19 = vpack.c.bf16 %v142_v14, %v140_v13  ;;  %v141_v21 = vld [vmem:[#allocation7 + $0xb0] sm:$0xff] }
  0x5e   :  { %652 = vmatpush3.bf16.msra.mxu1 %v651_v45  ;;  %v144_v22 = vld [vmem:[#allocation7 + $0xc8] sm:$0xff]  ;;  %v665_v23 = vpack.c.bf16 %v392_v16, %v390_v15  ;;  %v146_v24 = vld [vmem:[#allocation7 + $0xd8] sm:$0xff]  ;;  %v389_v25 = vld [vmem:[#allocation10] sm:$0xff]  ;;  %v591_v31 = vpack.c.bf16 %v141_v21, %v139_v20 }
  0x5f   :  { %654 = vmatprep.subr.bf16.mxu1 %v653_v49  ;;  %580 = vmatpush1.bf16.msra.mxu0 %v579_v60  ;;  %v391_v26 = vld [vmem:[#allocation10 + $0x10] sm:$0xff]  ;;  %v394_v27 = vld [vmem:[#allocation10 + $0x28] sm:$0xff]  ;;  %v396_v28 = vld [vmem:[#allocation10 + $0x38] sm:$0xff]  ;;  %v593_v32 = vpack.c.bf16 %v146_v24, %v144_v22 }
  0x60   :  { %582 = vmatprep.subr.bf16.mxu0 %v581_v63  ;;  %v937_v29 = vld [vmem:[#allocation4] sm:$0xff]  ;;  %v939_v30 = vld [vmem:[#allocation4 + $0x18] sm:$0xff]  ;;  %v145_v34 = vld [vmem:[#allocation7 + $0xd0] sm:$0xff]  ;;  %v667_v36 = vpack.c.bf16 %v391_v26, %v389_v25  ;;  %v669_v38 = vpack.c.bf16 %v396_v28, %v394_v27 }
  0x61   :  { %v143_v33 = vld [vmem:[#allocation7 + $0xc0] sm:$0xff]  ;;  %v148_v35 = vld [vmem:[#allocation7 + $0xe8] sm:$0xff]  ;;  %v150_v37 = vld [vmem:[#allocation7 + $0xf8] sm:$0xff] }
  0x62   :  { %656 = vmatpush3.bf16.msra.mxu1 %v655_v57  ;;  %v393_v39 = vld [vmem:[#allocation10 + $0x20] sm:$0xff]  ;;  %v395_v40 = vld [vmem:[#allocation10 + $0x30] sm:$0xff]  ;;  %v398_v41 = vld [vmem:[#allocation10 + $0x48] sm:$0xff]  ;;  %v595_v44 = vpack.c.bf16 %v145_v34, %v143_v33  ;;  %v597_v45 = vpack.c.bf16 %v150_v37, %v148_v35 }
  0x63   :  { %658 = vmatprep.subr.bf16.mxu1 %v657_v61  ;;  %584 = vmatpush1.bf16.msra.mxu0 %v583_v8  ;;  %v400_v42 = vld [vmem:[#allocation10 + $0x58] sm:$0xff]  ;;  %v943_v43 = vld [vmem:[#allocation4 + $0x10] sm:$0xff]  ;;  %v147_v46 = vld [vmem:[#allocation7 + $0xe0] sm:$0xff]  ;;  %v671_v49 = vpack.c.bf16 %v395_v40, %v393_v39 }
  0x64   :  { %586 = vmatprep.subr.bf16.mxu0 %v585_v10  ;;  %v149_v47 = vld [vmem:[#allocation7 + $0xf0] sm:$0xff]  ;;  %v152_v48 = vld [vmem:[#allocation7 + $0x108] sm:$0xff]  ;;  %v154_v50 = vld [vmem:[#allocation7 + $0x118] sm:$0xff]  ;;  %v673_v51 = vpack.c.bf16 %v400_v42, %v398_v41 }
  0x65   :  { %v397_v52 = vld [vmem:[#allocation10 + $0x40] sm:$0xff]  ;;  %v399_v53 = vld [vmem:[#allocation10 + $0x50] sm:$0xff]  ;;  %v402_v54 = vld [vmem:[#allocation10 + $0x68] sm:$0xff]  ;;  %v599_v56 = vpack.c.bf16 %v149_v47, %v147_v46  ;;  %v601_v57 = vpack.c.bf16 %v154_v50, %v152_v48 }
  0x66   :  { %660 = vmatpush3.bf16.msra.mxu1 %v659_v5  ;;  %v404_v55 = vld [vmem:[#allocation10 + $0x78] sm:$0xff]  ;;  %v151_v58 = vld [vmem:[#allocation7 + $0x100] sm:$0xff]  ;;  %v153_v59 = vld [vmem:[#allocation7 + $0x110] sm:$0xff]  ;;  %v675_v61 = vpack.c.bf16 %v399_v53, %v397_v52 }
  0x67   :  { %662 = vmatprep.subr.bf16.mxu1 %v661_v9  ;;  %588 = vmatpush1.bf16.msra.mxu0 %v587_v18  ;;  %v156_v60 = vld [vmem:[#allocation7 + $0x128] sm:$0xff]  ;;  %v158_v62 = vld [vmem:[#allocation7 + $0x138] sm:$0xff]  ;;  %v677_v63 = vpack.c.bf16 %v404_v55, %v402_v54  ;;  %v401_v0 = vld [vmem:[#allocation10 + $0x60] sm:$0xff]  ;;  %v603_v4 = vpack.c.bf16 %v153_v59, %v151_v58 }
  0x68   :  { %590 = vmatprep.subr.bf16.mxu0 %v589_v19  ;;  %v403_v1 = vld [vmem:[#allocation10 + $0x70] sm:$0xff]  ;;  %v406_v2 = vld [vmem:[#allocation10 + $0x88] sm:$0xff]  ;;  %v408_v3 = vld [vmem:[#allocation10 + $0x98] sm:$0xff]  ;;  %v605_v5 = vpack.c.bf16 %v158_v62, %v156_v60 }
  0x69   :  { %v155_v6 = vld [vmem:[#allocation7 + $0x120] sm:$0xff]  ;;  %v157_v7 = vld [vmem:[#allocation7 + $0x130] sm:$0xff]  ;;  %v160_v8 = vld [vmem:[#allocation7 + $0x148] sm:$0xff]  ;;  %v679_v9 = vpack.c.bf16 %v403_v1, %v401_v0  ;;  %v681_v11 = vpack.c.bf16 %v408_v3, %v406_v2 }
  0x6a   :  { %664 = vmatpush3.bf16.msra.mxu1 %v663_v17  ;;  %v162_v10 = vld [vmem:[#allocation7 + $0x158] sm:$0xff]  ;;  %v405_v12 = vld [vmem:[#allocation10 + $0x80] sm:$0xff]  ;;  %v407_v13 = vld [vmem:[#allocation10 + $0x90] sm:$0xff]  ;;  %v607_v16 = vpack.c.bf16 %v157_v7, %v155_v6  ;;  %v841_v7 = vmov 0.0  }
  0x6b   :  { %666 = vmatprep.subr.bf16.mxu1 %v665_v23  ;;  %592 = vmatpush1.bf16.msra.mxu0 %v591_v31  ;;  %v410_v14 = vld [vmem:[#allocation10 + $0xa8] sm:$0xff]  ;;  %v412_v15 = vld [vmem:[#allocation10 + $0xb8] sm:$0xff]  ;;  %v609_v17 = vpack.c.bf16 %v162_v10, %v160_v8  ;;  %v159_v18 = vld [vmem:[#allocation7 + $0x140] sm:$0xff]  ;;  %v683_v21 = vpack.c.bf16 %v407_v13, %v405_v12 }
  0x6c   :  { %594 = vmatprep.subr.bf16.mxu0 %v593_v32  ;;  %v161_v19 = vld [vmem:[#allocation7 + $0x150] sm:$0xff]  ;;  %v164_v20 = vld [vmem:[#allocation7 + $0x168] sm:$0xff]  ;;  %v166_v22 = vld [vmem:[#allocation7 + $0x178] sm:$0xff]  ;;  %v685_v23 = vpack.c.bf16 %v412_v15, %v410_v14  ;;  %v90_v15 = vlaneseq }
  0x6d   :  { %370 = vmatmul.mubr.f32.vlgmr.msra.gmra.mrb[0].mxu1 %v937_v29  ;;  %v409_v24 = vld [vmem:[#allocation10 + $0xa0] sm:$0xff]  ;;  %v411_v25 = vld [vmem:[#allocation10 + $0xb0] sm:$0xff]  ;;  %v414_v26 = vld [vmem:[#allocation10 + $0xc8] sm:$0xff]  ;;  %v611_v28 = vpack.c.bf16 %v161_v19, %v159_v18  ;;  %v613_v31 = vpack.c.bf16 %v166_v22, %v164_v20 }
  0x6e   :  { %374 = vmatprep.mubr.f32.mxu1 %v939_v30  ;;  %668 = vmatpush1.bf16.msra.mxu1 %v667_v36  ;;  %v416_v27 = vld [vmem:[#allocation10 + $0xd8] sm:$0xff]  ;;  %v163_v32 = vld [vmem:[#allocation7 + $0x160] sm:$0xff]  ;;  %v165_v33 = vld [vmem:[#allocation7 + $0x170] sm:$0xff]  ;;  %v687_v35 = vpack.c.bf16 %v411_v25, %v409_v24 }
  0x6f   :  { %670 = vmatprep.subr.bf16.mxu1 %v669_v38  ;;  %596 = vmatpush1.bf16.msra.mxu0 %v595_v44  ;;  %v168_v34 = vld [vmem:[#allocation7 + $0x188] sm:$0xff]  ;;  %v170_v36 = vld [vmem:[#allocation7 + $0x198] sm:$0xff]  ;;  %v689_v37 = vpack.c.bf16 %v416_v27, %v414_v26  ;;  %v413_v38 = vld [vmem:[#allocation10 + $0xc0] sm:$0xff]  ;;  %v615_v40 = vpack.c.bf16 %v165_v33, %v163_v32 }
  0x70   :  { %598 = vmatprep.subr.bf16.mxu0 %v597_v45  ;;  %v415_v39 = vld [vmem:[#allocation10 + $0xd0] sm:$0xff]  ;;  %v617_v41 = vpack.c.bf16 %v170_v36, %v168_v34  ;;  %v167_v42 = vld [vmem:[#allocation7 + $0x180] sm:$0xff]  ;;  %v172_v46 = vld [vmem:[#allocation7 + $0x1a8] sm:$0xff] }
  0x71   :  { %375 = vmatmul.mubr.f32.gmra.mrb[2].mxu1 %v943_v43  ;;  %v169_v44 = vld [vmem:[#allocation7 + $0x190] sm:$0xff]  ;;  %v691_v45 = vpack.c.bf16 %v415_v39, %v413_v38  ;;  %v174_v47 = vld [vmem:[#allocation7 + $0x1b8] sm:$0xff]  ;;  %v171_v50 = vld [vmem:[#allocation7 + $0x1a0] sm:$0xff] }
  0x72   :  { %672 = vmatpush1.bf16.msra.mxu1 %v671_v49  ;;  %v619_v48 = vpack.c.bf16 %v169_v44, %v167_v42  ;;  %v621_v49 = vpack.c.bf16 %v174_v47, %v172_v46  ;;  %v176_v52 = vld [vmem:[#allocation7 + $0x1c8] sm:$0xff]  ;;  %v178_v53 = vld [vmem:[#allocation7 + $0x1d8] sm:$0xff]  ;;  %v179_v62 = vld [vmem:[#allocation7 + $0x1e0] sm:$0xff]  ;;  %485 = vmatprep.mubr.f32.mxu1 %v841_v7 }
  0x73   :  { %674 = vmatprep.subr.bf16.mxu1 %v673_v51  ;;  %600 = vmatpush1.bf16.msra.mxu0 %v599_v56  ;;  %v173_v51 = vld [vmem:[#allocation7 + $0x1b0] sm:$0xff]  ;;  %v625_v55 = vpack.c.bf16 %v178_v53, %v176_v52  ;;  %v175_v56 = vld [vmem:[#allocation7 + $0x1c0] sm:$0xff]  ;;  %v180_v58 = vld [vmem:[#allocation7 + $0x1e8] sm:$0xff] }
  0x74   :  { %602 = vmatprep.subr.bf16.mxu0 %v601_v57  ;;  %v623_v54 = vpack.c.bf16 %v173_v51, %v171_v50  ;;  %v177_v57 = vld [vmem:[#allocation7 + $0x1d0] sm:$0xff]  ;;  %v182_v59 = vld [vmem:[#allocation7 + $0x1f8] sm:$0xff]  ;;  %v418_v1 = vld [vmem:[#allocation10 + $0xe8] sm:$0xff] }
  0x75   :  { %v627_v60 = vpack.c.bf16 %v177_v57, %v175_v56  ;;  %v420_v2 = vld [vmem:[#allocation10 + $0xf8] sm:$0xff]  ;;  %v88_v18 = vld [vmem:[%s969_s2] sm:$0x3]  ;;  %s803_s2 = scalar_lea.vmem %s516_s20, 512 }
  0x76   :  { %676 = vmatpush1.bf16.msra.mxu1 %v675_v61  ;;  %v629_v61 = vpack.c.bf16 %v182_v59, %v180_v58  ;;  %v693_v3 = vpack.c.bf16 %v420_v2, %v418_v1  ;;  %p804_p4 = scmp.ne.s32.totalorder %s516_s20, %s803_s2  ;;  %p809_p6 = scmp.lt.s32.totalorder %s803_s2, %s803_s2 }
  0x77   :  { %678 = vmatprep.subr.bf16.mxu1 %v677_v63  ;;  %604 = vmatpush1.bf16.msra.mxu0 %v603_v4  ;;  %v181_v63 = vld [vmem:[#allocation7 + $0x1f0] sm:$0xff]  ;;  %v417_v4 = vld [vmem:[#allocation10 + $0xe0] sm:$0xff] }
  0x78   :  { %606 = vmatprep.subr.bf16.mxu0 %v605_v5  ;;  %v631_v0 = vpack.c.bf16 %v181_v63, %v179_v62  ;;  %v419_v5 = vld [vmem:[#allocation10 + $0xf0] sm:$0xff]  ;;  %p810_p7 = por %p809_p6, %p808_p5 }
  0x79   :  { %v695_v6 = vpack.c.bf16 %v419_v5, %v417_v4 }
  0x7a   :  { %680 = vmatpush1.bf16.msra.mxu1 %v679_v9  ;;  %p811_p8 = pnand %p810_p7, %p804_p4 }
  0x7b   :  { %682 = vmatprep.subr.bf16.mxu1 %v681_v11  ;;  %608 = vmatpush1.bf16.msra.mxu0 %v607_v16  ;;  %v91_v16 = vshrl.u32 %v90_v15, 7 }
  0x7c   :  { %610 = vmatprep.subr.bf16.mxu0 %v609_v17 }
  0x7d   :  { %v92_v17 = vsub.s32 0, %v91_v16  ;;  %v96_v19 = vsub.s32 1, %v91_v16 }
  0x7e   :  { %684 = vmatpush1.bf16.msra.mxu1 %v683_v21 }
  0x7f   :  { %686 = vmatprep.subr.bf16.mxu1 %v685_v23  ;;  %612 = vmatpush1.bf16.msra.mxu0 %v611_v28  ;;  %v93_v20 = vrot.slane %v88_v18, %v92_v17  ;;  %v97_v21 = vrot.slane %v88_v18, %v96_v19 }
  0x80   :  { %614 = vmatprep.subr.bf16.mxu0 %v613_v31 }
  0x82   :  { %688 = vmatpush1.bf16.msra.mxu1 %v687_v35 }
  0x83   :  { %690 = vmatprep.subr.bf16.mxu1 %v689_v37  ;;  %616 = vmatpush1.bf16.msra.mxu0 %v615_v40 }
  0x84   :  { %618 = vmatprep.subr.bf16.mxu0 %v617_v41 }
  0x86   :  { %692 = vmatpush1.bf16.msra.mxu1 %v691_v45 }
  0x87   :  { %620 = vmatpush1.bf16.msra.mxu0 %v619_v48  ;;  %694 = vmatprep.subr.bf16.mxu1 %v693_v3 }
  0x88   :  { %622 = vmatprep.subr.bf16.mxu0 %v621_v49 }
  0x8a   :  { %696 = vmatpush1.bf16.msra.mxu1 %v695_v6 }
  0x8b   :  { %624 = vmatpush1.bf16.msra.mxu0 %v623_v54 }
  0x8c   :  { %626 = vmatprep.subr.bf16.mxu0 %v625_v55 }
  0x8f   :  { %628 = vmatpush1.bf16.msra.mxu0 %v627_v60 }
  0x90   :  { %630 = vmatprep.subr.bf16.mxu0 %v629_v61 }
  0x93   :  { %632 = vmatpush1.bf16.msra.mxu0 %v631_v0 }
  0x96   :  { %248 = vmatmul.mubr.f32.vlgmr.msra.gmra.mrb[0].mxu0 %v937_v29 }
  0x97   :  { %253 = vmatprep.mubr.f32.mxu0 %v939_v30 }
  0x9a   :  { %254 = vmatmul.mubr.f32.gmra.mrb[2].mxu0 %v943_v43 }
 0x140   :  { %v563_v8 = vpop.f32.mrb[0].mxu1 }
 0x141   :  { %v564_v9 = vpop.f32.mrb[1].mxu1 }
 0x142   :  { %v565_v10 = vadd.f32 %v564_v9, %v563_v8 }
 0x144   :  { %v566_v11 = vpop.f32.mrb[2].mxu1  ;;  %486 = vmatmul.mubr.f32.vlgmr.msra.gmra.mrb[4].mxu1 %v565_v10 }
 0x145   :  { %v567_v29 = vpop.f32.mrb[3].mxu1  ;;  %491 = vmatprep.mubr.f32.mxu1 %v841_v7 }
 0x146   :  { %v568_v30 = vadd.f32 %v567_v29, %v566_v11 }
 0x148   :  { %492 = vmatmul.mubr.f32.gmra.mrb[6].mxu1 %v568_v30 }
 0x169   :  { %v249_v43 = vpop.f32.mrb[0].mxu0 }
 0x16a   :  { %v251_v12 = vpop.f32.mrb[1].mxu0  ;;  %v260_v22 = vadd.f32 %v249_v43, %v93_v20 }
 0x16b   :  { %v261_v23 = vadd.f32 %v251_v12, %v97_v21 }
 0x16d   :  { %v255_v13 = vpop.f32.mrb[2].mxu0 }
 0x16e   :  { %v257_v14 = vpop.f32.mrb[3].mxu0  ;;  %v262_v26 = vadd.f32 %v255_v13, %v93_v20 }
 0x16f   :  { %v263_v31 = vadd.f32 %v257_v14, %v97_v21 }
 0x217   :  { %v487_v24 = vpop.f32.mrb[4].mxu1 }
 0x218   :  { %v502_v25 = vadd.f32 %v487_v24, %v260_v22  ;;  %v489_v27 = vpop.f32.mrb[5].mxu1 }
 0x219   :  { %v503_v28 = vadd.f32 %v489_v27, %v261_v23 }
 0x21a   :  { %506 = vst [vmem:[#allocation12] sm:$0xff] %v502_v25 }
 0x21b   :  { %507 = vst [vmem:[#allocation12 + $0x8] sm:$0xff] %v503_v28  ;;  %v493_v32 = vpop.f32.mrb[6].mxu1 }
 0x21c   :  { %v504_v33 = vadd.f32 %v493_v32, %v262_v26  ;;  %v495_v34 = vpop.f32.mrb[7].mxu1 }
 0x21d   :  { %v505_v35 = vadd.f32 %v495_v34, %v263_v31 }
 0x21e   :  { %508 = vst [vmem:[#allocation12 + $0x10] sm:$0xff] %v504_v33 }
 0x21f   :  { %509 = vst [vmem:[#allocation12 + $0x18] sm:$0xff] %v505_v35 }
 0x220   :  { %814 = shalt.err (!%p811_p8)
}
 0x221   :  { %s815_s24 = scalar_lea.hbm %s972_s5, 512 }
 0x222   :  { %p816_p9 = scmp.ne.s32.totalorder %s972_s5, %s815_s24  ;;  %p819_p10 = scmp.lt.u32.totalorder %s815_s24, %s972_s5 }
 0x224   :  { %p821_p11 = pnand %p819_p10, %p816_p9 }
 0x226   :  { %824 = shalt.err (!%p821_p11)
}
 0x227   :  { %521 = dma.vmem_to_hbm [thread:$0]  %s516_s20, 512, %s972_s5, [#allocation6], %s835_s30, %s835_s30, %s836_s6  }
 0x228   :  { %831 = dma.done.wait [#allocation6], 512  }
 0x229   :  { %832 = vsyncadd [#allocation6], 4294966784 }
 0x22a   :  { %525 = vsyncpa [#allocation5], 1 }
 0x22b   :  { %526 = vsyncpa [#allocation8], 1 }
 0x22c   :  { %527 = vsyncpa [#allocation11], 1 }
 0x22d   :  { %528 = vsyncpa [#allocation6], 1 }

</bundles_post_ra>
